<compile_context>
chip_gen: v6e
topology: v6e:2x2x1
jax: 0.10.0
libtpu: 0.0.40
codegen_flags: <defaults>
</compile_context>

<pallas_src>
import jax
import jax.numpy as jnp
from jax.experimental import pallas as pl
from jax.experimental.pallas import tpu as pltpu


def _log_softmax_kernel(x_ref, o_ref):
    # x_ref / o_ref: (TB, C_pad) tile resident in VMEM.  Padded class lanes hold -inf.
    # Dropout(p=1e-6) in eval mode is identity.
    # TODO(synk): training-mode dropout (random mask + 1/(1-p) scaling) not emitted;
    #             inference semantics only.
    x = x_ref[...]                                   # keep input dtype (bf16 stays bf16)
    m = jnp.max(x, axis=1, keepdims=True)            # -inf pad never wins the max
    shifted = (x - m).astype(jnp.float32)            # f32 only for the exp/log path
    lse = jnp.log(jnp.sum(jnp.exp(shifted), axis=1, keepdims=True))
    o_ref[...] = (shifted - lse).astype(o_ref.dtype)


def _round_up(x: int, m: int) -> int:
    return ((x + m - 1) // m) * m


def base_clf_forward(logits: jax.Array) -> jax.Array:
    """Dropout(eval)=identity followed by LogSoftmax(dim=1), matching BaseCLF.act."""
    B, C = logits.shape
    dt = logits.dtype
    itemsize = jnp.dtype(dt).itemsize
    sublane = {4: 8, 2: 16, 1: 32}.get(itemsize, 8)

    # Lane-dense class axis: pad to a multiple of 128 with -inf (exact for log-softmax).
    C_pad = _round_up(max(C, 128), 128)

    # Batch tile: big enough to pipeline, small enough that ~4 live f32 tiles stay far
    # below the 16 MiB (v5e) / 32 MiB (v6e/v7x) scoped-VMEM defaults.
    vmem_cap_rows = max(sublane, ((2 * 1024 * 1024) // (C_pad * 4)) // sublane * sublane)
    TB = min(512, vmem_cap_rows, _round_up(B, sublane))
    B_pad = _round_up(B, TB)

    x = logits
    if C_pad != C:
        x = jnp.pad(x, ((0, 0), (0, C_pad - C)), constant_values=-jnp.inf)
    if B_pad != B:
        # Padded rows are finite (zeros) so they compute harmlessly; sliced off below.
        x = jnp.pad(x, ((0, B_pad - B), (0, 0)), constant_values=0.0)

    grid = (B_pad // TB,)
    cost = pl.CostEstimate(
        flops=5 * B_pad * C_pad,
        transcendentals=B_pad * C_pad + B_pad,        # exp per element + log per row
        bytes_accessed=2 * B_pad * C_pad * itemsize,  # read + write
    )

    out = pl.pallas_call(
        _log_softmax_kernel,
        out_shape=jax.ShapeDtypeStruct((B_pad, C_pad), dt),
        grid_spec=pltpu.PrefetchScalarGridSpec(
            num_scalar_prefetch=0,
            grid=grid,
            in_specs=[pl.BlockSpec((TB, C_pad), lambda i: (i, 0))],
            out_specs=pl.BlockSpec((TB, C_pad), lambda i: (i, 0)),
        ),
        compiler_params=pltpu.CompilerParams(
            dimension_semantics=("parallel",),        # rows independent -> megacore on v7x
        ),
        cost_estimate=cost,
    )(x)

    return out[:B, :C]


if __name__ == "__main__":
    key = jax.random.PRNGKey(0)

    # Primary case: classifier-head shaped logits (batch=2, num_classes=4).
    x_small = jax.random.normal(key, (2, 4), dtype=jnp.float32)
    out_small = jax.block_until_ready(base_clf_forward(x_small))
    ref_small = jax.nn.log_softmax(x_small, axis=1)
    assert out_small.shape == x_small.shape
    assert jnp.allclose(out_small, ref_small, atol=1e-5, rtol=1e-5)

    # Secondary case: exercises batch tiling (multiple grid steps) and class padding.
    k2 = jax.random.PRNGKey(1)
    x_big = jax.random.normal(k2, (1037, 130), dtype=jnp.float32)
    out_big = jax.block_until_ready(base_clf_forward(x_big))
    ref_big = jax.nn.log_softmax(x_big, axis=1)
    assert out_big.shape == x_big.shape
    assert jnp.allclose(out_big, ref_big, atol=1e-5, rtol=1e-5)

    print("KERNEL_OK")
</pallas_src>

<mosaic_0001>
module attributes {stable_mosaic.version = 11 : i64} {
  func.func @_log_softmax_kernel(%arg0: i32, %arg1: memref<8x128xf32, #tpu.memory_space<vmem>>, %arg2: memref<8x128xf32, #tpu.memory_space<vmem>>) attributes {dimension_semantics = [#tpu.dimension_semantics<parallel>], iteration_bounds = array<i64: 1>, scalar_prefetch = 0 : i64, scratch_operands = 0 : i64, tpu.core_type = #tpu.core_type<tc>, window_params = [{transform_indices = @transform_0, window_bounds = array<i64: 8, 128>}, {transform_indices = @transform_1, window_bounds = array<i64: 8, 128>}]} {
    %c0 = arith.constant 0 : index
    %c0_0 = arith.constant 0 : index
    %0 = vector.load %arg1[%c0, %c0_0] : memref<8x128xf32, #tpu.memory_space<vmem>>, vector<8x128xf32>
    %cst = arith.constant dense<0xFF800000> : vector<8xf32>
    %1 = vector.multi_reduction <maximumf>, %0, %cst [1] : vector<8x128xf32> to vector<8xf32>
    %2 = vector.shape_cast %1 : vector<8xf32> to vector<8x1xf32>
    %3 = vector.broadcast %2 : vector<8x1xf32> to vector<8x128xf32>
    %4 = arith.subf %0, %3 : vector<8x128xf32>
    %5 = math.exp %4 : vector<8x128xf32>
    %cst_1 = arith.constant dense<0.000000e+00> : vector<8xf32>
    %6 = vector.multi_reduction <add>, %5, %cst_1 [1] : vector<8x128xf32> to vector<8xf32>
    %7 = vector.shape_cast %6 : vector<8xf32> to vector<8x1xf32>
    %8 = math.log %7 : vector<8x1xf32>
    %9 = vector.broadcast %8 : vector<8x1xf32> to vector<8x128xf32>
    %10 = arith.subf %4, %9 : vector<8x128xf32>
    %c0_2 = arith.constant 0 : index
    %c0_3 = arith.constant 0 : index
    %11 = vector.load %arg2[%c0_2, %c0_3] : memref<8x128xf32, #tpu.memory_space<vmem>>, vector<8x128xf32>
    tpu.vector_store %arg2[%c0_2, %c0_3], %10 {strides = array<i32>} : memref<8x128xf32, #tpu.memory_space<vmem>>, vector<8x128xf32>,
    return
  }
  func.func @transform_0(%arg0: i32) -> (i32, i32) {
    %c0_i32 = arith.constant 0 : i32
    %c0_i32_0 = arith.constant 0 : i32
    return %arg0, %c0_i32 : i32, i32
  }
  func.func @transform_1(%arg0: i32) -> (i32, i32) {
    %c0_i32 = arith.constant 0 : i32
    %c0_i32_0 = arith.constant 0 : i32
    return %arg0, %c0_i32 : i32, i32
  }
}

</mosaic_0001>

<bundles_post_ra>
// kernel: tpu_custom_call.1
= control target key start
LH: loop header
LB: loop body
LE: loop exit
PB: predicated region body
PF: predicated region fallthrough
CT: control target
= control target key end

     0   :  { %6 = vsyncpa [#allocation3], 0  ;;  %s116_s0 = inlined_call_operand.hbm [shape: f32[8,128], index: 0, kind: input, shape index: {}]   ;;  %s117_s1 = inlined_call_operand.hbm [shape: f32[8,128], index: 1, kind: output, shape index: {}]  }
   0x1   :  { %7 = vsyncpa [#allocation4], 0  ;;  %s98_s6 = smov [#allocation2]  }
   0x2   :  { %s14_s7 = sshll.u32 %s98_s6, 4  ;;  %s15_s7 = int_to_ptr.vmem [resolvable:$true] %s14_s7 }
   0x3   :  { %s62_s8 = scalar_lea.vmem %s15_s7, 128  ;;  %p67_p1 = scmp.lt.s32.totalorder %s15_s7, %s15_s7 }
   0x4   :  { %p63_p0 = scmp.ne.s32.totalorder %s15_s7, %s62_s8  ;;  %p68_p2 = scmp.lt.s32.totalorder %s62_s8, %s62_s8 }
   0x6   :  { %p69_p3 = por %p68_p2, %p67_p1 }
   0x8   :  { %p70_p4 = pnand %p69_p3, %p63_p0 }
   0xa   :  { %73 = shalt.err (!%p70_p4)
}
   0xb   :  { %17 = dma.hbm_to_vmem [thread:$0]  %s116_s0, 128, %s15_s7, [#allocation3]  }
   0xc   :  { %94 = dma.done.wait [#allocation3], 128  }
   0xd   :  { %95 = vsyncadd [#allocation3], 4294967168  ;;  %v21_v0 = vld [vmem:[#allocation2] sm:$0xff]  ;;  %s99_s11 = smov [#allocation5]  }
   0xe   :  { %22 = vmax.xlane.f32.xlu0 %v21_v0  ;;  %s39_s12 = sshll.u32 %s99_s11, 4  ;;  %s40_s12 = int_to_ptr.vmem [resolvable:$true] %s39_s12 }
   0xf   :  { %s74_s0 = scalar_lea.vmem %s40_s12, 128  ;;  %p79_p6 = scmp.lt.s32.totalorder %s40_s12, %s40_s12 }
  0x10   :  { %p75_p5 = scmp.ne.s32.totalorder %s40_s12, %s74_s0  ;;  %p80_p7 = scmp.lt.s32.totalorder %s74_s0, %s74_s0 }
  0x12   :  { %p81_p8 = por %p80_p7, %p79_p6 }
  0x14   :  { %p82_p9 = pnand %p81_p8, %p75_p5 }
  0x97   :  { %v23_v1 = vpop.xlane.xlu0 %22 }
  0x98   :  { %v24_v2 = vsub.f32 %v21_v0, %v23_v1 }
  0x9a   :  { %v25_v3 = vmul.f32 1.442695, %v24_v2 }
  0x9c   :  { %50 = vpow2.f32 %v25_v3 }
  0xa9   :  { %v51_v4 = vpop.eup %50 }
  0xaa   :  { %27 = vadd.xlane.f32.xlu0 %v51_v4 }
 0x133   :  { %v28_v5 = vpop.xlane.xlu0 %27 }
 0x134   :  { %52 = vlog2.f32 %v28_v5 }
 0x141   :  { %v53_v6 = vpop.eup %52 }
 0x142   :  { %v30_v7 = vmul.f32 0.6931472, %v53_v6 }
 0x144   :  { %v31_v8 = vsub.f32 %v24_v2, %v30_v7 }
 0x146   :  { %32 = vst [vmem:[#allocation5] sm:$0xff] %v31_v8 }
 0x147   :  { %85 = shalt.err (!%p82_p9)
}
 0x148   :  { %42 = dma.vmem_to_hbm [thread:$0]  %s40_s12, 128, %s117_s1, [#allocation4]  }
 0x149   :  { %96 = dma.done.wait [#allocation4], 128  }
 0x14a   :  { %97 = vsyncadd [#allocation4], 4294967168 }
 0x14b   :  { %46 = vsyncpa [#allocation3], 1 }
 0x14c   :  { %47 = vsyncpa [#allocation4], 1 }

</bundles_post_ra>
